<compile_context>
chip_gen: v7x
topology: tpu7x:2x2x1
jax: 0.10.0
libtpu: 0.0.40
codegen_flags: <defaults>
</compile_context>

<pallas_src>
import math

import jax
import jax.numpy as jnp
from jax.experimental import pallas as pl
from jax.experimental.pallas import tpu as pltpu

_LANES = 128


def _copy_kernel(x_ref, o_ref):
    # Identity copy of one (block_rows, 128) tile: the entire "forward pass"
    # of Reshape is data movement.
    o_ref[...] = x_ref[...]


def _sublane_multiple(dtype):
    # (sublane, lane) packing: 8 rows for 32-bit, 16 for 16-bit, 32 for 8-bit.
    itemsize = jnp.dtype(dtype).itemsize
    return 8 * max(1, 4 // itemsize)


def _resolve_shape(total, target_shape):
    """Resolve a single -1 like torch.Tensor.view does."""
    target_shape = tuple(int(d) for d in target_shape)
    if -1 in target_shape:
        assert target_shape.count(-1) == 1, "only one -1 allowed in view shape"
        known = math.prod(d for d in target_shape if d != -1)
        assert known > 0 and total % known == 0, "view size mismatch"
        target_shape = tuple(total // known if d == -1 else d
                             for d in target_shape)
    assert math.prod(target_shape) == total, "view size mismatch"
    return target_shape


def pallas_reshape(x, target_shape, *, tile_rows=None, use_pallas=True):
    """Reproduces `x.view(target_shape)` for contiguous x (row-major)."""
    total = math.prod(x.shape)
    target_shape = _resolve_shape(total, target_shape)

    # Metadata-only path: reshape of a contiguous array is free.  Used when
    # explicitly requested, for empty tensors, and for totals that are not a
    # multiple of 128 lanes (where a kernel would need pad + slice, i.e. two
    # extra full passes over the data).
    if (not use_pallas) or total == 0 or total % _LANES != 0:
        return jnp.reshape(x, target_shape)

    rows = total // _LANES
    flat2d = jnp.reshape(x, (rows, _LANES))  # row-major relayout, no compute

    sub = _sublane_multiple(x.dtype)
    if tile_rows is None:
        # ~1 MiB per block -> ~4 MiB VMEM with double-buffered input+output:
        # large enough to approach HBM roofline, small enough for the default
        # scoped-VMEM limit on v5e (16 MiB) / v6e (32 MiB) / v7x (32 MiB).
        itemsize = jnp.dtype(x.dtype).itemsize
        tile_rows = (1 << 20) // (_LANES * itemsize)
    # Keep the block sublane-aligned for this dtype.
    tile_rows = max(sub, (tile_rows // sub) * sub)

    if rows <= tile_rows:
        block_rows = rows       # full extent along this dim -> always legal
    else:
        block_rows = tile_rows  # multiple of sublane packing; last block masked

    grid = (pl.cdiv(rows, block_rows),)

    out2d = pl.pallas_call(
        _copy_kernel,
        out_shape=jax.ShapeDtypeStruct((rows, _LANES), x.dtype),
        grid_spec=pltpu.PrefetchScalarGridSpec(
            num_scalar_prefetch=0,
            grid=grid,
            in_specs=[pl.BlockSpec((block_rows, _LANES), lambda i: (i, 0))],
            out_specs=pl.BlockSpec((block_rows, _LANES), lambda i: (i, 0)),
        ),
        compiler_params=pltpu.CompilerParams(
            dimension_semantics=("parallel",),
        ),
        # Input and output have identical shape/dtype: donate the input
        # buffer so XLA does not allocate a second full-size HBM array.
        input_output_aliases={0: 0},
    )(flat2d)

    return jnp.reshape(out2d, target_shape)


class ReshapeModule:
    """JAX/Pallas equivalent of the PyTorch Reshape nn.Module."""

    def __init__(self, *args):
        self.shape = args  # no parameters in the torch module

    def __call__(self, x):
        return pallas_reshape(x, self.shape)


if __name__ == "__main__":
    key = jax.random.PRNGKey(0)
    # Small NCHW-ish input, consistent with typical use of Reshape in
    # PointNet-style heads: (B, C, H, W) -> (B, C*H*W).
    B, C, H, W = 2, 4, 16, 16
    x = jax.random.normal(key, (B, C, H, W), dtype=jnp.float32)

    module = ReshapeModule(B, C * H * W)
    y = jax.block_until_ready(module(x))

    # Reference: plain row-major reshape (== torch .view on contiguous input).
    ref = x.reshape(B, C * H * W)
    assert y.shape == (B, C * H * W)
    assert y.dtype == x.dtype
    assert bool(jnp.all(y == ref))

    # Also exercise a -1 dimension, like torch view supports.
    y2 = jax.block_until_ready(ReshapeModule(-1, W)(x))
    assert y2.shape == (B * C * H, W)
    assert bool(jnp.all(y2 == x.reshape(-1, W)))

    # Exercise the metadata-only path too (no kernel, same semantics).
    y3 = jax.block_until_ready(pallas_reshape(x, (B, -1), use_pallas=False))
    assert bool(jnp.all(y3 == ref))

    print("KERNEL_OK")
</pallas_src>

<mosaic_0001>
module attributes {stable_mosaic.version = 11 : i64} {
  func.func @_copy_kernel(%arg0: i32, %arg1: memref<16x128xf32, #tpu.memory_space<vmem>>, %arg2: memref<16x128xf32, #tpu.memory_space<vmem>>) attributes {dimension_semantics = [#tpu.dimension_semantics<parallel>], iteration_bounds = array<i64: 1>, scalar_prefetch = 0 : i64, scratch_operands = 0 : i64, tpu.core_type = #tpu.core_type<tc>, window_params = [{transform_indices = @transform_0, window_bounds = array<i64: 16, 128>}, {transform_indices = @transform_1, window_bounds = array<i64: 16, 128>}]} {
    %c0 = arith.constant 0 : index
    %c0_0 = arith.constant 0 : index
    %0 = vector.load %arg1[%c0, %c0_0] : memref<16x128xf32, #tpu.memory_space<vmem>>, vector<16x128xf32>
    %c0_1 = arith.constant 0 : index
    %c0_2 = arith.constant 0 : index
    %1 = vector.load %arg2[%c0_1, %c0_2] : memref<16x128xf32, #tpu.memory_space<vmem>>, vector<16x128xf32>
    tpu.vector_store %arg2[%c0_1, %c0_2], %0 {strides = array<i32>} : memref<16x128xf32, #tpu.memory_space<vmem>>, vector<16x128xf32>,
    return
  }
  func.func @transform_0(%arg0: i32) -> (i32, i32) {
    %c0_i32 = arith.constant 0 : i32
    %c0_i32_0 = arith.constant 0 : i32
    return %arg0, %c0_i32 : i32, i32
  }
  func.func @transform_1(%arg0: i32) -> (i32, i32) {
    %c0_i32 = arith.constant 0 : i32
    %c0_i32_0 = arith.constant 0 : i32
    return %arg0, %c0_i32 : i32, i32
  }
}

</mosaic_0001>

<bundles_post_ra>
// kernel: tpu_custom_call.1
= control target key start
LH: loop header
LB: loop body
LE: loop exit
PB: predicated region body
PF: predicated region fallthrough
CT: control target
= control target key end

     0   :  { %6 = vsyncpa [#allocation3], 0  ;;  %s134_s0 = inlined_call_operand.hbm [shape: f32[16,128], index: 0, kind: input, shape index: {}, may-alias: {0,1}]   ;;  %s135_s1 = inlined_call_operand.hbm [shape: f32[16,128], index: 1, kind: output, shape index: {}, may-alias: {0,1}]  }
   0x1   :  { %7 = vsyncpa [#allocation4], 0  ;;  %s96_s6 = smov [#allocation2]   ;;  %s48_s10 = scalar_lea.hbm %s134_s0, 256 }
   0x2   :  { %s13_s7 = sshll.u32 %s96_s6, 4  ;;  %p49_p0 = scmp.ne.s32.totalorder %s134_s0, %s48_s10  ;;  %s14_s7 = int_to_ptr.vmem [resolvable:$true] %s13_s7 }
   0x3   :  { %p52_p1 = scmp.lt.u32.totalorder %s48_s10, %s134_s0 }
   0x5   :  { %p54_p2 = pnand %p52_p1, %p49_p0 }
   0x7   :  { %57 = shalt.err (!%p54_p2)
}
   0x8   :  { %s58_s15 = scalar_lea.vmem %s14_s7, 256  ;;  %p63_p4 = scmp.lt.s32.totalorder %s14_s7, %s14_s7 }
   0x9   :  { %p59_p3 = scmp.ne.s32.totalorder %s14_s7, %s58_s15  ;;  %p64_p5 = scmp.lt.s32.totalorder %s58_s15, %s58_s15 }
   0xb   :  { %p65_p6 = por %p64_p5, %p63_p4 }
   0xd   :  { %p66_p7 = pnand %p65_p6, %p59_p3 }
   0xf   :  { %69 = shalt.err (!%p66_p7)
}
  0x10   :  { %s97_s16 = smov 128   ;;  %s98_s17 = smov 8  }
  0x11   :  { %19 = dma.hbm_to_vmem [thread:$0]  %s134_s0, 256, %s14_s7, [#allocation3], %s97_s16, %s97_s16, %s98_s17  }
  0x12   :  { %92 = dma.done.wait [#allocation3], 256  }
  0x13   :  { %93 = vsyncadd [#allocation3], 4294967040  ;;  %s99_s20 = smov [#allocation5]   ;;  %v23_v0 = vld [vmem:[#allocation2] sm:$0xff]  ;;  %v24_v1 = vld [vmem:[#allocation2 + $0x8] sm:$0xff] }
  0x14   :  { %s32_s21 = sshll.u32 %s99_s20, 4  ;;  %25 = vst [vmem:[#allocation5] sm:$0xff] %v23_v0  ;;  %26 = vst [vmem:[#allocation5 + $0x8] sm:$0xff] %v24_v1  ;;  %s33_s21 = int_to_ptr.vmem [resolvable:$true] %s32_s21 }
  0x15   :  { %s70_s22 = scalar_lea.vmem %s33_s21, 256  ;;  %p75_p9 = scmp.lt.s32.totalorder %s33_s21, %s33_s21 }
  0x16   :  { %p71_p8 = scmp.ne.s32.totalorder %s33_s21, %s70_s22  ;;  %p76_p10 = scmp.lt.s32.totalorder %s70_s22, %s70_s22 }
  0x18   :  { %p77_p11 = por %p76_p10, %p75_p9 }
  0x1a   :  { %p78_p12 = pnand %p77_p11, %p71_p8 }
  0x1c   :  { %81 = shalt.err (!%p78_p12)
}
  0x1d   :  { %s82_s0 = scalar_lea.hbm %s135_s1, 256 }
  0x1e   :  { %p83_p13 = scmp.ne.s32.totalorder %s135_s1, %s82_s0  ;;  %p86_p0 = scmp.lt.u32.totalorder %s82_s0, %s135_s1 }
  0x20   :  { %p88_p1 = pnand %p86_p0, %p83_p13 }
  0x22   :  { %91 = shalt.err (!%p88_p1)
}
  0x23   :  { %38 = dma.vmem_to_hbm [thread:$0]  %s33_s21, 256, %s135_s1, [#allocation4], %s97_s16, %s97_s16, %s98_s17  }
  0x24   :  { %94 = dma.done.wait [#allocation4], 256  }
  0x25   :  { %95 = vsyncadd [#allocation4], 4294967040 }
  0x26   :  { %42 = vsyncpa [#allocation3], 1 }
  0x27   :  { %43 = vsyncpa [#allocation4], 1 }

</bundles_post_ra>
